<compile_context>
chip_gen: v5e
topology: v5e:2x2
jax: 0.10.0
libtpu: 0.0.40
codegen_flags: <defaults>
</compile_context>

<pallas_src>
import math

import jax
import jax.numpy as jnp
from jax.experimental import pallas as pl
from jax.experimental.pallas import tpu as pltpu


def _linear_attention_kernel(x_ref, mask_ref, w1_ref, b1_ref, w2_ref, b2_ref,
                             o_ref):
    # x_ref   : (TB, L, D)   TB batch elements' tokens
    # mask_ref: (TB, L)      validity mask, lane-dense (L on the 128-lane axis)
    # w1_ref  : (D, H), b1_ref: (1, H)
    # w2_ref  : (H, heads), b2_ref: (1, heads)
    # o_ref   : (TB, D)      pooled embeddings (lane-dense output slab)
    tb, seq_len, d = x_ref.shape
    heads = w2_ref.shape[1]

    x3 = x_ref[...].astype(jnp.float32)                   # (TB, L, D)
    x2 = x3.reshape(tb * seq_len, d)                      # fold batch into MXU M dim

    # Two linear layers as tall matmuls over TB*L rows.
    h = jnp.tanh(jnp.dot(x2, w1_ref[...],
                         preferred_element_type=jnp.float32) + b1_ref[...])   # (TB*L, H)
    logits = jnp.dot(h, w2_ref[...],
                     preferred_element_type=jnp.float32) + b2_ref[...]        # (TB*L, heads)
    logits3 = logits.reshape(tb, seq_len, heads)           # layout-free split (L % 8 == 0)

    # Masked softmax over the sequence axis (axis=1 here == torch softmax(dim=-1)
    # after the (1,2) transpose). Mask broadcasts across the heads lane axis.
    mask = mask_ref[...]                                   # (TB, L)
    minus_inf = jnp.float32(-9000000000000000.0)
    e = jnp.where(mask[:, :, None] > 0.5, logits3, minus_inf)   # (TB, L, heads)
    m = jnp.max(e, axis=1, keepdims=True)                  # (TB, 1, heads)
    p = jnp.exp(e - m)                                     # (TB, L, heads)
    z = jnp.sum(p, axis=1, keepdims=True)                  # (TB, 1, heads)
    att = p * (1.0 / z)                                    # (TB, L, heads)

    # Head-mean folded into the pooling weights:
    #   mean_h(att) @ x  ==  mean_h(att @ x)   (matmul is linear in att)
    wvec = jnp.sum(att, axis=2, keepdims=True) * (1.0 / heads)   # (TB, L, 1)

    pooled = jnp.sum(x3 * wvec, axis=1)                    # (TB, D), lane-dense
    o_ref[...] = pooled.astype(o_ref.dtype)


def _choose_tb(B, L, D, H, vmem_budget_bytes=8 * 1024 * 1024):
    """How many batch elements to fold into one grid step.

    Targets TB*L ~ 512 MXU rows, then shrinks until the double-buffered input
    block plus the f32 working set fits a conservative VMEM budget (safe for
    v7x's 64 MiB physical VMEM as well as v5e/v6e's 128 MiB)."""
    lanes = 128

    def footprint(tb):
        rows = tb * L
        x_blk = 2 * rows * D * 4                            # double-buffered input
        out_blk = 2 * tb * max(D, lanes) * 4                # double-buffered output
        mask_blk = 2 * tb * max(L, lanes) * 4               # lane-padded mask block
        work = rows * (D + max(H, lanes) + 2 * lanes) * 4   # h/logits/att live values
        return x_blk + out_blk + mask_blk + work

    tb = max(1, 512 // max(L, 1))
    while tb > 8 and footprint(tb) > vmem_budget_bytes:
        tb //= 2
    if tb >= B:
        return B                       # one block covers the whole batch
    # Keep the sublane dim of the mask/output blocks 8-aligned (BlockSpec rule).
    return max(8, (tb // 8) * 8)


def linear_attention(x, masks, w1, b1, w2, b2, heads):
    """x: (B, L, D) f32, masks: (B, 1, L) f32. Returns (B, D) f32."""
    B, L, D = x.shape
    H = w1.shape[1]

    # Lane-dense mask: (B, 1, L) -> (B, L) is a free reshape (no HBM transpose).
    mask2d = masks.reshape(B, L)

    TB = _choose_tb(B, L, D, H)
    B_pad = ((B + TB - 1) // TB) * TB
    if B_pad != B:
        # Pad with zero tokens / all-valid masks; padded rows are sliced off.
        x = jnp.pad(x, ((0, B_pad - B), (0, 0), (0, 0)))
        mask2d = jnp.pad(mask2d, ((0, B_pad - B), (0, 0)), constant_values=1.0)

    grid = (B_pad // TB,)

    out = pl.pallas_call(
        _linear_attention_kernel,
        out_shape=jax.ShapeDtypeStruct((B_pad, D), jnp.float32),
        grid_spec=pltpu.PrefetchScalarGridSpec(
            num_scalar_prefetch=0,
            grid=grid,
            in_specs=[
                pl.BlockSpec((TB, L, D), lambda b: (b, 0, 0)),   # x block
                pl.BlockSpec((TB, L), lambda b: (b, 0)),         # mask (lane-dense)
                # Weights: constant index maps -> VMEM-resident across steps.
                pl.BlockSpec((D, H), lambda b: (0, 0)),          # w1
                pl.BlockSpec((1, H), lambda b: (0, 0)),          # b1
                pl.BlockSpec((H, heads), lambda b: (0, 0)),      # w2
                pl.BlockSpec((1, heads), lambda b: (0, 0)),      # b2
            ],
            out_specs=pl.BlockSpec((TB, D), lambda b: (b, 0)),   # lane-dense slab
        ),
        compiler_params=pltpu.CompilerParams(
            dimension_semantics=("parallel",),
            vmem_limit_bytes=32 * 1024 * 1024),
    )(x, mask2d, w1, b1, w2, b2)
    return out[:B]


def _reference(x, masks, w1, b1, w2, b2, heads):
    h = jnp.tanh(x @ w1 + b1[0])
    logits = h @ w2 + b2[0]                       # (B, L, heads)
    att = jnp.swapaxes(logits, 1, 2)              # (B, heads, L)
    e = jnp.where(masks > 0.5, att, -9000000000000000.0)
    p = jax.nn.softmax(e, axis=-1)
    emb = p @ x                                   # (B, heads, D)
    return jnp.sum(emb, axis=1) / heads


if __name__ == "__main__":
    B, L, D, H, HEADS = 2, 8, 128, 32, 10

    key = jax.random.PRNGKey(0)
    kx, km, k1, k2, k3, k4 = jax.random.split(key, 6)

    x = jax.random.normal(kx, (B, L, D), dtype=jnp.float32)
    masks = (jax.random.uniform(km, (B, 1, L)) > 0.3).astype(jnp.float32)
    masks = masks.at[:, :, 0].set(1.0)  # ensure at least one unmasked position

    # Deterministic synthetic parameters (same shapes as torch nn.Linear, stored
    # transposed: weight is (in, out) so the kernel does x @ W + b).
    lim1 = 1.0 / math.sqrt(D)
    w1 = jax.random.uniform(k1, (D, H), minval=-lim1, maxval=lim1, dtype=jnp.float32)
    b1 = jax.random.uniform(k2, (1, H), minval=-lim1, maxval=lim1, dtype=jnp.float32)
    lim2 = 1.0 / math.sqrt(H)
    w2 = jax.random.uniform(k3, (H, HEADS), minval=-lim2, maxval=lim2, dtype=jnp.float32)
    b2 = jax.random.uniform(k4, (1, HEADS), minval=-lim2, maxval=lim2, dtype=jnp.float32)

    out = linear_attention(x, masks, w1, b1, w2, b2, HEADS)
    out = jax.block_until_ready(out)

    ref = _reference(x, masks, w1, b1, w2, b2, HEADS)
    assert out.shape == (B, D)
    assert jnp.allclose(out, ref, rtol=1e-5, atol=1e-5), "mismatch vs plain-JAX reference"

    print("KERNEL_OK")
</pallas_src>

<mosaic_0001>
module attributes {stable_mosaic.version = 11 : i64} {
  func.func @_linear_attention_kernel(%arg0: i32, %arg1: memref<2x8x128xf32, #tpu.memory_space<vmem>>, %arg2: memref<2x8xf32, #tpu.memory_space<vmem>>, %arg3: memref<128x32xf32, #tpu.memory_space<vmem>>, %arg4: memref<1x32xf32, #tpu.memory_space<vmem>>, %arg5: memref<32x10xf32, #tpu.memory_space<vmem>>, %arg6: memref<1x10xf32, #tpu.memory_space<vmem>>, %arg7: memref<2x128xf32, #tpu.memory_space<vmem>>) attributes {dimension_semantics = [#tpu.dimension_semantics<parallel>], iteration_bounds = array<i64: 1>, scalar_prefetch = 0 : i64, scratch_operands = 0 : i64, tpu.core_type = #tpu.core_type<tc>, window_params = [{transform_indices = @transform_0, window_bounds = array<i64: 2, 8, 128>}, {transform_indices = @transform_1, window_bounds = array<i64: 2, 8>}, {pipeline_mode = #tpu.pipeline_mode<synchronous>, transform_indices = @transform_2, window_bounds = array<i64: 128, 32>}, {pipeline_mode = #tpu.pipeline_mode<synchronous>, transform_indices = @transform_3, window_bounds = array<i64: 1, 32>}, {pipeline_mode = #tpu.pipeline_mode<synchronous>, transform_indices = @transform_4, window_bounds = array<i64: 32, 10>}, {pipeline_mode = #tpu.pipeline_mode<synchronous>, transform_indices = @transform_5, window_bounds = array<i64: 1, 10>}, {transform_indices = @transform_6, window_bounds = array<i64: 2, 128>}]} {
    %c0 = arith.constant 0 : index
    %c0_0 = arith.constant 0 : index
    %c0_1 = arith.constant 0 : index
    %0 = vector.load %arg1[%c0, %c0_0, %c0_1] : memref<2x8x128xf32, #tpu.memory_space<vmem>>, vector<2x8x128xf32>
    %1 = vector.shape_cast %0 : vector<2x8x128xf32> to vector<16x128xf32>
    %c0_2 = arith.constant 0 : index
    %c0_3 = arith.constant 0 : index
    %2 = vector.load %arg3[%c0_2, %c0_3] : memref<128x32xf32, #tpu.memory_space<vmem>>, vector<128x32xf32>
    %cst = arith.constant dense<0.000000e+00> : vector<16x32xf32>
    %3 = tpu.matmul %1, %2, %cst {dimension_numbers = #tpu.dot_dimension_numbers<[1], [0], [0], [1], [0, 0, 1, 1], [], []>} : vector<16x128xf32>, vector<128x32xf32>, vector<16x32xf32> -> vector<16x32xf32>
    %c0_4 = arith.constant 0 : index
    %c0_5 = arith.constant 0 : index
    %4 = vector.load %arg4[%c0_4, %c0_5] : memref<1x32xf32, #tpu.memory_space<vmem>>, vector<1x32xf32>
    %5 = vector.broadcast %4 : vector<1x32xf32> to vector<16x32xf32>
    %6 = arith.addf %3, %5 : vector<16x32xf32>
    %7 = math.tanh %6 : vector<16x32xf32>
    %c0_6 = arith.constant 0 : index
    %c0_7 = arith.constant 0 : index
    %8 = vector.load %arg5[%c0_6, %c0_7] : memref<32x10xf32, #tpu.memory_space<vmem>>, vector<32x10xf32>
    %cst_8 = arith.constant dense<0.000000e+00> : vector<16x10xf32>
    %9 = tpu.matmul %7, %8, %cst_8 {dimension_numbers = #tpu.dot_dimension_numbers<[1], [0], [0], [1], [0, 0, 1, 1], [], []>} : vector<16x32xf32>, vector<32x10xf32>, vector<16x10xf32> -> vector<16x10xf32>
    %c0_9 = arith.constant 0 : index
    %c0_10 = arith.constant 0 : index
    %10 = vector.load %arg6[%c0_9, %c0_10] : memref<1x10xf32, #tpu.memory_space<vmem>>, vector<1x10xf32>
    %11 = vector.broadcast %10 : vector<1x10xf32> to vector<16x10xf32>
    %12 = arith.addf %9, %11 : vector<16x10xf32>
    %13 = vector.shape_cast %12 : vector<16x10xf32> to vector<2x8x10xf32>
    %c0_11 = arith.constant 0 : index
    %c0_12 = arith.constant 0 : index
    %14 = vector.load %arg2[%c0_11, %c0_12] : memref<2x8xf32, #tpu.memory_space<vmem>>, vector<2x8xf32>
    %15 = vector.shape_cast %14 : vector<2x8xf32> to vector<2x8x1xf32>
    %cst_13 = arith.constant 5.000000e-01 : f32
    %16 = vector.broadcast %cst_13 : f32 to vector<2x8x1xf32>
    %17 = arith.cmpf ogt, %15, %16 : vector<2x8x1xf32>
    %cst_14 = arith.constant -9.000000e+15 : f32
    %18 = vector.shape_cast %17 : vector<2x8x1xi1> to vector<2x8x1xi1>
    %19 = vector.broadcast %18 : vector<2x8x1xi1> to vector<2x8x10xi1>
    %20 = vector.broadcast %cst_14 : f32 to vector<2x8x10xf32>
    %21 = arith.select %19, %13, %20 : vector<2x8x10xi1>, vector<2x8x10xf32>
    %cst_15 = arith.constant dense<0xFF800000> : vector<2x10xf32>
    %22 = vector.multi_reduction <maximumf>, %21, %cst_15 [1] : vector<2x8x10xf32> to vector<2x10xf32>
    %23 = vector.shape_cast %22 : vector<2x10xf32> to vector<2x1x10xf32>
    %24 = vector.broadcast %23 : vector<2x1x10xf32> to vector<2x8x10xf32>
    %25 = arith.subf %21, %24 : vector<2x8x10xf32>
    %26 = math.exp %25 : vector<2x8x10xf32>
    %cst_16 = arith.constant dense<0.000000e+00> : vector<2x10xf32>
    %27 = vector.multi_reduction <add>, %26, %cst_16 [1] : vector<2x8x10xf32> to vector<2x10xf32>
    %28 = vector.shape_cast %27 : vector<2x10xf32> to vector<2x1x10xf32>
    %cst_17 = arith.constant 1.000000e+00 : f32
    %29 = vector.broadcast %cst_17 : f32 to vector<2x1x10xf32>
    %30 = arith.divf %29, %28 : vector<2x1x10xf32>
    %31 = vector.broadcast %30 : vector<2x1x10xf32> to vector<2x8x10xf32>
    %32 = arith.mulf %26, %31 : vector<2x8x10xf32>
    %cst_18 = arith.constant dense<0.000000e+00> : vector<2x8xf32>
    %33 = vector.multi_reduction <add>, %32, %cst_18 [2] : vector<2x8x10xf32> to vector<2x8xf32>
    %34 = vector.shape_cast %33 : vector<2x8xf32> to vector<2x8x1xf32>
    %cst_19 = arith.constant 1.000000e-01 : f32
    %35 = vector.broadcast %cst_19 : f32 to vector<2x8x1xf32>
    %36 = arith.mulf %34, %35 : vector<2x8x1xf32>
    %37 = vector.broadcast %36 : vector<2x8x1xf32> to vector<2x8x128xf32>
    %38 = arith.mulf %0, %37 : vector<2x8x128xf32>
    %cst_20 = arith.constant dense<0.000000e+00> : vector<2x128xf32>
    %39 = vector.multi_reduction <add>, %38, %cst_20 [1] : vector<2x8x128xf32> to vector<2x128xf32>
    %c0_21 = arith.constant 0 : index
    %c0_22 = arith.constant 0 : index
    %40 = vector.load %arg7[%c0_21, %c0_22] : memref<2x128xf32, #tpu.memory_space<vmem>>, vector<2x128xf32>
    tpu.vector_store %arg7[%c0_21, %c0_22], %39 {strides = array<i32>} : memref<2x128xf32, #tpu.memory_space<vmem>>, vector<2x128xf32>,
    return
  }
  func.func @transform_0(%arg0: i32) -> (i32, i32, i32) {
    %c0_i32 = arith.constant 0 : i32
    %c0_i32_0 = arith.constant 0 : i32
    %c0_i32_1 = arith.constant 0 : i32
    return %arg0, %c0_i32, %c0_i32_0 : i32, i32, i32
  }
  func.func @transform_1(%arg0: i32) -> (i32, i32) {
    %c0_i32 = arith.constant 0 : i32
    %c0_i32_0 = arith.constant 0 : i32
    return %arg0, %c0_i32 : i32, i32
  }
  func.func @transform_2(%arg0: i32) -> (i32, i32) {
    %c0_i32 = arith.constant 0 : i32
    %c0_i32_0 = arith.constant 0 : i32
    %c0_i32_1 = arith.constant 0 : i32
    return %c0_i32, %c0_i32_0 : i32, i32
  }
  func.func @transform_3(%arg0: i32) -> (i32, i32) {
    %c0_i32 = arith.constant 0 : i32
    %c0_i32_0 = arith.constant 0 : i32
    %c0_i32_1 = arith.constant 0 : i32
    return %c0_i32, %c0_i32_0 : i32, i32
  }
  func.func @transform_4(%arg0: i32) -> (i32, i32) {
    %c0_i32 = arith.constant 0 : i32
    %c0_i32_0 = arith.constant 0 : i32
    %c0_i32_1 = arith.constant 0 : i32
    return %c0_i32, %c0_i32_0 : i32, i32
  }
  func.func @transform_5(%arg0: i32) -> (i32, i32) {
    %c0_i32 = arith.constant 0 : i32
    %c0_i32_0 = arith.constant 0 : i32
    %c0_i32_1 = arith.constant 0 : i32
    return %c0_i32, %c0_i32_0 : i32, i32
  }
  func.func @transform_6(%arg0: i32) -> (i32, i32) {
    %c0_i32 = arith.constant 0 : i32
    %c0_i32_0 = arith.constant 0 : i32
    return %arg0, %c0_i32 : i32, i32
  }
}

</mosaic_0001>

<bundles_post_ra>
// kernel: tpu_custom_call.1
= control target key start
LH: loop header
LB: loop body
LE: loop exit
PB: predicated region body
PF: predicated region fallthrough
CT: control target
= control target key end

     0   :  { %s431_s0 = inlined_call_operand.vmem [shape: f32[2,8,128], index: 0, kind: input, shape index: {}]   ;;  %s432_s1 = inlined_call_operand.vmem [shape: f32[2,8], index: 1, kind: input, shape index: {}]   ;;  %s433_s2 = inlined_call_operand.vmem [shape: f32[128,32], index: 2, kind: input, shape index: {}]   ;;  %s434_s3 = inlined_call_operand.vmem [shape: f32[1,32], index: 3, kind: input, shape index: {}]   ;;  %s435_s4 = inlined_call_operand.vmem [shape: f32[32,10], index: 4, kind: input, shape index: {}]   ;;  %s436_s5 = inlined_call_operand.vmem [shape: f32[1,10], index: 5, kind: input, shape index: {}]   ;;  %s437_s6 = inlined_call_operand.hbm [shape: f32[2,128], index: 6, kind: output, shape index: {}]  }
   0x1   :  { %v41_v0 = vld [vmem:[%s433_s2 + $0x78] sm:$0xff]  ;;  %v40_v1 = vld [vmem:[%s433_s2 + $0x70] sm:$0xff]  ;;  %v39_v2 = vld [vmem:[%s433_s2 + $0x68] sm:$0xff] }
   0x2   :  { %46 = vmatpush.msra.mxu0 %v41_v0  ;;  %245 = vmatpush.msra.mxu2 %v41_v0  ;;  %v38_v3 = vld [vmem:[%s433_s2 + $0x60] sm:$0xff]  ;;  %v37_v4 = vld [vmem:[%s433_s2 + $0x58] sm:$0xff] }
   0x4   :  { %47 = vmatpush.msra.mxu0 %v40_v1  ;;  %246 = vmatpush.msra.mxu2 %v40_v1 }
   0x6   :  { %48 = vmatpush.msra.mxu0 %v39_v2  ;;  %247 = vmatpush.msra.mxu2 %v39_v2 }
   0x8   :  { %49 = vmatpush.msra.mxu0 %v38_v3  ;;  %248 = vmatpush.msra.mxu2 %v38_v3 }
   0x9   :  { %11 = vsyncpa [#allocation3], 0  ;;  %v36_v5 = vld [vmem:[%s433_s2 + $0x50] sm:$0xff]  ;;  %v35_v6 = vld [vmem:[%s433_s2 + $0x48] sm:$0xff]  ;;  %v111_v19 = vlaneseq  ;;  %vm79_vm0 = vcmask 261120   ;;  %vm132_vm2 = vcmask 80896  }
   0xa   :  { %50 = vmatpush.msra.mxu0 %v37_v4  ;;  %249 = vmatpush.msra.mxu2 %v37_v4  ;;  %v34_v7 = vld [vmem:[%s433_s2 + $0x40] sm:$0xff]  ;;  %v33_v8 = vld [vmem:[%s433_s2 + $0x38] sm:$0xff]  ;;  %v32_v9 = vld [vmem:[%s433_s2 + $0x30] sm:$0xff]  ;;  %s234_s21 = sshll.u32 %s437_s6, 4  ;;  %vm223_vm12 = vcmask 1041409   ;;  %s235_s21 = int_to_ptr.hbm [resolvable:$true] %s234_s21 }
   0xb   :  { %v31_v10 = vld [vmem:[%s433_s2 + $0x28] sm:$0xff]  ;;  %v30_v11 = vld [vmem:[%s433_s2 + $0x20] sm:$0xff]  ;;  %v29_v12 = vld [vmem:[%s433_s2 + $0x18] sm:$0xff]  ;;  %v112_v21 = vshrl.u32 %v111_v19, 7 }
   0xc   :  { %51 = vmatpush.msra.mxu0 %v36_v5  ;;  %250 = vmatpush.msra.mxu2 %v36_v5  ;;  %v28_v13 = vld [vmem:[%s433_s2 + $0x10] sm:$0xff]  ;;  %v27_v14 = vld [vmem:[%s433_s2 + $0x8] sm:$0xff]  ;;  %v26_v15 = vld [vmem:[%s433_s2] sm:$0xff] }
   0xd   :  { %v390_v16 = vld [vmem:[%s431_s0] sm:$0xff]  ;;  %v395_v17 = vld [vmem:[%s431_s0 + $0x8] sm:$0xff]  ;;  %v74_v18 = vld [vmem:[%s435_s4 + $0x18] sm:$0xff]  ;;  %262 = vset.pattern.permute.xlu0 %v112_v21 }
   0xe   :  { %52 = vmatpush.msra.mxu0 %v35_v6  ;;  %251 = vmatpush.msra.mxu2 %v35_v6  ;;  %v73_v20 = vld [vmem:[%s435_s4 + $0x10] sm:$0xff]  ;;  %v72_v22 = vld [vmem:[%s435_s4 + $0x8] sm:$0xff]  ;;  %v71_v23 = vld [vmem:[%s435_s4] sm:$0xff] }
   0xf   :  { %98 = vmatpush.msra.mxu1 %v74_v18  ;;  %v109_v24 = vld [vmem:[%s432_s1] sm:$0x3] }
  0x10   :  { %53 = vmatpush.msra.mxu0 %v34_v7  ;;  %252 = vmatpush.msra.mxu2 %v34_v7  ;;  %v110_v25 = vperm.slane %v109_v24, 0  ;;  %v117_v26 = vperm.slane %v109_v24, 1  ;;  %v263_v27 = vld [vmem:[%s434_s3] ss:$0 sm:$0xff]  ;;  %s303_s3 = smov [#allocation2]  }
  0x11   :  { %99 = vmatpush.msra.mxu1 %v73_v20  ;;  %v264_v35 = vld [vmem:[%s436_s5] ss:$0 sm:$0xff]  ;;  %s232_s5 = sshll.u32 %s303_s3, 4  ;;  %s233_s5 = int_to_ptr.vmem [resolvable:$true] %s232_s5 }
  0x12   :  { %54 = vmatpush.msra.mxu0 %v33_v8  ;;  %253 = vmatpush.msra.mxu2 %v33_v8 }
  0x13   :  { %100 = vmatpush.msra.mxu1 %v72_v22 }
  0x14   :  { %55 = vmatpush.msra.mxu0 %v32_v9  ;;  %254 = vmatpush.msra.mxu2 %v32_v9 }
  0x15   :  { %101 = vmatpush.msra.mxu1 %v71_v23  ;;  %115 = vperm.xlu0 %262, %v110_v25  }
  0x16   :  { %56 = vmatpush.msra.mxu0 %v31_v10  ;;  %255 = vmatpush.msra.mxu2 %v31_v10 }
  0x18   :  { %57 = vmatpush.msra.mxu0 %v30_v11  ;;  %256 = vmatpush.msra.mxu2 %v30_v11 }
  0x1a   :  { %58 = vmatpush.msra.mxu0 %v29_v12  ;;  %257 = vmatpush.msra.mxu2 %v29_v12 }
  0x1c   :  { %59 = vmatpush.msra.mxu0 %v28_v13  ;;  %258 = vmatpush.msra.mxu2 %v28_v13 }
  0x1d   :  { %122 = vperm.xlu0 %262, %v117_v26  }
  0x1e   :  { %60 = vmatpush.msra.mxu0 %v27_v14  ;;  %259 = vmatpush.msra.mxu2 %v27_v14 }
  0x20   :  { %61 = vmatpush.msra.mxu0 %v26_v15  ;;  %260 = vmatpush.msra.mxu2 %v26_v15 }
  0x21   :  { %62 = vmatmul.f32.vlgmr.msra.gmra.mxu0 %v390_v16  ;;  %65 = vmatmul.f32.vlgmr.msra.gmra.mxu2 %v395_v17 }
  0x87   :  { %v116_v34 = vpop.permute.xlu0 %115 }
  0x88   :  { %vm124_vm1 = vcmp.gt.f32.partialorder %v116_v34, 0.5 }
  0x8f   :  { %v123_v42 = vpop.permute.xlu0 %122 }
  0x90   :  { %vm125_vm3 = vcmp.gt.f32.partialorder %v123_v42, 0.5 }
  0x9e   :  { %v63_v28 = vpop.f32.mrf.mxu0 }
  0x9f   :  { %v64_v29 = vadd.f32 %v263_v27, %v63_v28 }
  0xa1   :  { %265 = vtanh.f32 %v64_v29 }
  0xa4   :  { %v66_v30 = vpop.f32.mrf.mxu2 }
  0xa5   :  { %v67_v31 = vadd.f32 %v263_v27, %v66_v30 }
  0xa7   :  { %v266_v32 = vpop.eup %265  ;;  %267 = vtanh.f32 %v67_v31 }
  0xa8   :  { %243 = vmatmul.msk.f32.vlgmr.msra.gmra.mxu1 %vm79_vm0, %v266_v32 }
  0xad   :  { %v268_v33 = vpop.eup %267 }
  0xb0   :  { %244 = vmatmul.msk.f32.gmra.mxu1 %vm79_vm0, %v268_v33 }
 0x125   :  { %v103_v36 = vpop.f32.mrf.mxu1 }
 0x126   :  { %v104_v37 = vadd.f32 %v264_v35, %v103_v36 }
 0x128   :  { %v130_v38 = vsel %vm124_vm1, %v104_v37, -9e+15 }
 0x129   :  { %v133_v39 = vsel %vm132_vm2, %v130_v38, -inf }
 0x12a   :  { %v134_v40 = vrot.slane %v133_v39, 4 }
 0x12c   :  { %v135_v41 = vmax.f32 %v133_v39, %v134_v40 }
 0x12d   :  { %v106_v43 = vpop.f32.mrf.mxu1 }
 0x12e   :  { %v136_v44 = vrot.slane %v135_v41, 2  ;;  %v107_v45 = vadd.f32 %v264_v35, %v106_v43 }
 0x130   :  { %v137_v46 = vmax.f32 %v135_v41, %v136_v44  ;;  %v131_v47 = vsel %vm125_vm3, %v107_v45, -9e+15 }
 0x131   :  { %v140_v48 = vsel %vm132_vm2, %v131_v47, -inf }
 0x132   :  { %v138_v49 = vrot.slane %v137_v46, 1  ;;  %v141_v50 = vrot.slane %v140_v48, 4 }
 0x134   :  { %v139_v51 = vmax.f32 %v137_v46, %v138_v49  ;;  %v142_v52 = vmax.f32 %v140_v48, %v141_v50 }
 0x136   :  { %v147_v53 = vsub.f32 %v130_v38, %v139_v51  ;;  %v143_v54 = vrot.slane %v142_v52, 2 }
 0x138   :  { %v149_v55 = vmul.f32 1.442695, %v147_v53  ;;  %v144_v56 = vmax.f32 %v142_v52, %v143_v54 }
 0x13a   :  { %269 = vpow2.f32 %v149_v55  ;;  %v145_v57 = vrot.slane %v144_v56, 1 }
 0x13c   :  { %v146_v58 = vmax.f32 %v144_v56, %v145_v57 }
 0x13e   :  { %v148_v59 = vsub.f32 %v131_v47, %v146_v58 }
 0x140   :  { %v270_v60 = vpop.eup %269  ;;  %v151_v61 = vmul.f32 1.442695, %v148_v59 }
 0x141   :  { %v153_v62 = vsel %vm132_vm2, %v270_v60, 0.0 }
 0x142   :  { %v154_v63 = vrot.slane %v153_v62, 4  ;;  %271 = vpow2.f32 %v151_v61 }
 0x144   :  { %v155_v0 = vadd.f32 %v154_v63, %v153_v62 }
 0x146   :  { %v156_v1 = vrot.slane %v155_v0, 2 }
 0x148   :  { %v272_v2 = vpop.eup %271  ;;  %v157_v3 = vadd.f32 %v156_v1, %v155_v0 }
 0x149   :  { %v160_v4 = vsel %vm132_vm2, %v272_v2, 0.0 }
 0x14a   :  { %v158_v5 = vrot.slane %v157_v3, 1  ;;  %v161_v6 = vrot.slane %v160_v4, 4 }
 0x14c   :  { %v159_v7 = vadd.f32 %v158_v5, %v157_v3  ;;  %v162_v8 = vadd.f32 %v161_v6, %v160_v4 }
 0x14e   :  { %273 = vrcp.f32 %v159_v7  ;;  %v163_v9 = vrot.slane %v162_v8, 2  ;;  %v178_v18 = vand.u32 2147483648, %v159_v7  ;;  %v176_v20 = vand.u32 2147483647, %v159_v7 }
 0x14f   :  { %vm172_vm5 = vweird.f32 %v159_v7 }
 0x150   :  { %v164_v10 = vadd.f32 %v163_v9, %v162_v8  ;;  %v179_v23 = vor.u32 1.1754944e-38, %v178_v18  ;;  %vm177_vm7 = vcmp.eq.f32.partialorder %v176_v20, 8.507059e+37 }
 0x152   :  { %v165_v11 = vrot.slane %v164_v10, 1 }
 0x154   :  { %v274_v12 = vpop.eup %273  ;;  %v166_v13 = vadd.f32 %v165_v11, %v164_v10 }
 0x155   :  { %v168_v14 = vmul.f32 %v274_v12, %v159_v7  ;;  %vm173_vm4 = vweird.f32 %v274_v12 }
 0x156   :  { %275 = vrcp.f32 %v166_v13  ;;  %vm174_vm6 = vmor %vm172_vm5, %vm173_vm4  ;;  %v193_v29 = vand.u32 2147483648, %v166_v13  ;;  %v191_v32 = vand.u32 2147483647, %v166_v13  ;;  %vm187_vm9 = vweird.f32 %v166_v13 }
 0x157   :  { %v169_v15 = vsub.f32 1.0, %v168_v14 }
 0x158   :  { %v194_v34 = vor.u32 1.1754944e-38, %v193_v29  ;;  %vm192_vm11 = vcmp.eq.f32.partialorder %v191_v32, 8.507059e+37 }
 0x159   :  { %v170_v19 = vmul.f32 %v274_v12, %v169_v15 }
 0x15b   :  { %v171_v21 = vadd.f32 %v274_v12, %v170_v19 }
 0x15c   :  { %v276_v22 = vpop.eup %275 }
 0x15d   :  { %v175_v24 = vsel %vm174_vm6, %v274_v12, %v171_v21  ;;  %v183_v25 = vmul.f32 %v276_v22, %v166_v13  ;;  %vm188_vm8 = vweird.f32 %v276_v22 }
 0x15e   :  { %v180_v26 = vsel %vm177_vm7, %v179_v23, %v175_v24  ;;  %vm189_vm10 = vmor %vm187_vm9, %vm188_vm8 }
 0x15f   :  { %v197_v27 = vmul.f32 %v270_v60, %v180_v26  ;;  %v184_v28 = vsub.f32 1.0, %v183_v25 }
 0x161   :  { %v199_v30 = vsel %vm132_vm2, %v197_v27, 0.0  ;;  %v185_v31 = vmul.f32 %v276_v22, %v184_v28 }
 0x162   :  { %200 = vadd.xlane.f32.xlu1 %v199_v30 }
 0x163   :  { %v186_v33 = vadd.f32 %v276_v22, %v185_v31 }
 0x165   :  { %v190_v35 = vsel %vm189_vm10, %v276_v22, %v186_v33 }
 0x166   :  { %v195_v36 = vsel %vm192_vm11, %v194_v34, %v190_v35 }
 0x167   :  { %v198_v37 = vmul.f32 %v272_v2, %v195_v36 }
 0x169   :  { %v202_v38 = vsel %vm132_vm2, %v198_v37, 0.0 }
 0x16a   :  { %203 = vadd.xlane.f32.xlu1 %v202_v38 }
 0x1d5   :  { %v201_v39 = vpop.xlane.xlu1 %200 }
 0x1d6   :  { %v205_v40 = vmul.f32 0.1, %v201_v39 }
 0x1d8   :  { %v207_v41 = vmul.f32 %v205_v40, %v390_v16 }
 0x1da   :  { %v209_v42 = vrot.slane %v207_v41, 4 }
 0x1dc   :  { %v210_v43 = vadd.f32 %v209_v42, %v207_v41 }
 0x1dd   :  { %v204_v44 = vpop.xlane.xlu1 %203 }
 0x1de   :  { %v206_v45 = vmul.f32 0.1, %v204_v44  ;;  %v211_v46 = vrot.slane %v210_v43, 2 }
 0x1e0   :  { %v208_v47 = vmul.f32 %v206_v45, %v395_v17  ;;  %v212_v49 = vadd.f32 %v211_v46, %v210_v43 }
 0x1e2   :  { %v215_v48 = vrot.slane %v208_v47, 4  ;;  %v213_v52 = vrot.slane %v212_v49, 1 }
 0x1e4   :  { %v216_v50 = vadd.f32 %v215_v48, %v208_v47  ;;  %v214_v55 = vadd.f32 %v213_v52, %v212_v49 }
 0x1e6   :  { %v217_v51 = vrot.slane %v216_v50, 2 }
 0x1e8   :  { %v218_v53 = vadd.f32 %v217_v51, %v216_v50 }
 0x1ea   :  { %v219_v54 = vrot.slane %v218_v53, 1 }
 0x1ec   :  { %v220_v16 = vadd.f32 %v219_v54, %v218_v53 }
 0x1ee   :  { %v224_v56 = vsel %vm223_vm12, %v220_v16, %v214_v55 }
 0x1ef   :  { %226 = vst [vmem:[#allocation2] sm:$0x3] %v224_v56 }
 0x1f0   :  { %237 = dma.vmem_to_hbm [thread:$0]  %s233_s5, 32, %s235_s21, [#allocation3]  }
 0x1f1   :  { %301 = dma.done.wait [#allocation3], 32  }
 0x1f2   :  { %302 = vsyncadd [#allocation3], 4294967264 }
 0x1f3   :  { %242 = vsyncpa [#allocation3], 1 }

</bundles_post_ra>
